<compile_context>
chip_gen: v7x
topology: tpu7x:2x2x1
jax: 0.10.0
libtpu: 0.0.40
codegen_flags: <defaults>
</compile_context>

<pallas_src>
import functools
import math

import jax
import jax.numpy as jnp
from jax.experimental import pallas as pl
from jax.experimental.pallas import tpu as pltpu


INPUT_DIM = 16
HIDDEN_DIMS = (256, 256)
HEAD_DIM = 128
OUTPUT_DIM = 4
LN_EPS = 1e-5


def _round_up(n, m):
    return ((n + m - 1) // m) * m


def _gelu(x, approx):
    if approx:
        # tanh approximation -> EUP (idle VLIW slot); frees VALU bandwidth.
        return jax.nn.gelu(x, approximate=True)
    # Exact (erf-based) GELU, matching torch.nn.GELU() default.
    return 0.5 * x * (1.0 + jax.lax.erf(x * (1.0 / math.sqrt(2.0))))


def _layernorm(x, gamma, beta):
    # One-pass stats + fused scale/shift: y = x*scale + shift (fewer VALU passes).
    mu = jnp.mean(x, axis=-1, keepdims=True)
    var = jnp.mean(x * x, axis=-1, keepdims=True) - mu * mu
    scale = gamma * jax.lax.rsqrt(var + LN_EPS)
    shift = beta - mu * scale
    return x * scale + shift


def _dot(a, w):
    # Cast LHS to the weight dtype (f32 or bf16) for the MXU, accumulate in f32.
    return jnp.dot(a.astype(w.dtype), w, preferred_element_type=jnp.float32)


def dueling_dqn_kernel(
    x_ref,
    w1_ref, b1_ref, g1_ref, be1_ref,
    w2_ref, b2_ref, g2_ref, be2_ref,
    wh1_ref, bh1_ref,          # fused value/advantage first layers: (256, 256)
    wq_ref, bq_ref,            # fused head-output + dueling combine: (256, OUTPUT_DIM)
    q_ref,
    *, act_dtype, approx_gelu,
):
    x = x_ref[...]

    # Shared trunk: [Linear -> LayerNorm -> GELU -> (Dropout=id)] x 2.
    # LN stats always in f32; GELU optionally in bf16 (act_dtype) on v6e/v7x.
    h = _dot(x, w1_ref[...]) + b1_ref[...]
    h = _gelu(_layernorm(h, g1_ref[...], be1_ref[...]).astype(act_dtype), approx_gelu)

    h = _dot(h, w2_ref[...]) + b2_ref[...]
    h = _gelu(_layernorm(h, g2_ref[...], be2_ref[...]).astype(act_dtype), approx_gelu)

    # Fused heads' hidden layer: (tile, 256); cols [:128] value hid, [128:] adv hid.
    hh = _gelu((_dot(h, wh1_ref[...]) + bh1_ref[...]).astype(act_dtype), approx_gelu)

    # Fused dueling combine: q = v + (a - mean(a)) baked into wq/bq.
    q_ref[...] = (_dot(hh, wq_ref[...]) + bq_ref[...]).astype(q_ref.dtype)


def prepare_params(params, *, use_bf16_matmul=False):
    """One-time parameter fusion (hoisted out of the per-call forward path)."""
    f32 = jnp.float32
    mm_dtype = jnp.bfloat16 if use_bf16_matmul else f32

    # Heads' first layers -> one 256-wide matmul.
    wh1 = jnp.concatenate([params["wv1"], params["wa1"]], axis=1)          # (256, 256)
    bh1 = jnp.concatenate([params["bv1"], params["ba1"]], axis=1)          # (1, 256)

    # Fold value broadcast + advantage mean-subtraction into one weight:
    #   q = v * 1_{1x4} + a @ (I - 11^T/4)
    M = jnp.eye(OUTPUT_DIM, dtype=f32) - jnp.full(
        (OUTPUT_DIM, OUTPUT_DIM), 1.0 / OUTPUT_DIM, f32)
    wq_v = params["wv2"] @ jnp.ones((1, OUTPUT_DIM), f32)                  # (128, 4)
    wq_a = params["wa2"] @ M                                               # (128, 4)
    wq = jnp.concatenate([wq_v, wq_a], axis=0)                             # (256, 4)
    bq = params["bv2"] * jnp.ones((1, OUTPUT_DIM), f32) + params["ba2"] @ M

    # Matmul weights optionally bf16 (MXU-native on v5e/v6e/v7x); biases / LN
    # params stay f32.
    fused = (
        params["w1"].astype(mm_dtype), params["b1"], params["g1"], params["be1"],
        params["w2"].astype(mm_dtype), params["b2"], params["g2"], params["be2"],
        wh1.astype(mm_dtype), bh1,
        wq.astype(mm_dtype), bq,
    )
    return tuple(jnp.asarray(a) for a in fused)


def _choose_batch_tile(B):
    if B <= 128:
        # Small batches: minimal row padding (16 covers bf16 sublane packing;
        # 8 would suffice for f32). Avoids 8x wasted VALU work at B=16.
        return _round_up(max(B, 8), 16)
    # Large batches: big tiles amortize ~0.35us/grid-step overhead, but keep
    # >= 2 grid steps so the 'parallel' axis shards over v7x's 2 TensorCores.
    b128 = _round_up(B, 128)
    return min(1024, _round_up((b128 + 1) // 2, 128))


def dueling_dqn_forward(x, fused_params, *, batch_tile=None,
                        bf16_activations=False, approx_gelu=False):
    """Run the fused DuelingDQN forward. Returns (B, OUTPUT_DIM) float32.

    fused_params: output of prepare_params().
    bf16_activations / approx_gelu: fast paths for v6e/v7x (slight numeric
    deviation from the exact erf+f32 baseline).
    """
    B = x.shape[0]
    tile = batch_tile if batch_tile is not None else _choose_batch_tile(B)
    B_pad = _round_up(B, tile)
    if B_pad != B:
        x = jnp.pad(x, ((0, B_pad - B), (0, 0)))

    act_dtype = jnp.bfloat16 if bf16_activations else jnp.float32
    kernel = functools.partial(
        dueling_dqn_kernel, act_dtype=act_dtype, approx_gelu=approx_gelu)

    # Weights never change across grid steps -> single-buffered (Buffered(1)).
    def const_spec(arr):
        return pl.BlockSpec(arr.shape, lambda i: (0, 0),
                            pipeline_mode=pl.Buffered(1))

    in_specs = [pl.BlockSpec((tile, INPUT_DIM), lambda i: (i, 0))]
    in_specs += [const_spec(p) for p in fused_params]
    # Output is (tile, OUTPUT_DIM): last dim equals the full array dim (legal),
    # so there is no 128-lane slab, no wrapper lane-slice, 32x less writeback.
    out_spec = pl.BlockSpec((tile, OUTPUT_DIM), lambda i: (i, 0))

    q = pl.pallas_call(
        kernel,
        out_shape=jax.ShapeDtypeStruct((B_pad, OUTPUT_DIM), jnp.float32),
        grid_spec=pltpu.PrefetchScalarGridSpec(
            num_scalar_prefetch=0,
            grid=(B_pad // tile,),
            in_specs=in_specs,
            out_specs=out_spec,
        ),
        compiler_params=pltpu.CompilerParams(
            # Batch axis is embarrassingly parallel -> megacore sharding on v7x
            # when the grid has >= 2 steps. VMEM use at tile=1024 is ~3 MiB,
            # far below every generation's scoped limit.
            dimension_semantics=("parallel",),
        ),
    )(x, *fused_params)

    return q if B_pad == B else q[:B]


def init_params(key):
    """Deterministic parameter init (uniform, Kaiming-ish scale like torch Linear)."""
    keys = jax.random.split(key, 16)
    ki = iter(keys)

    def linear(in_dim, out_dim):
        bound = 1.0 / math.sqrt(in_dim)
        w = jax.random.uniform(next(ki), (in_dim, out_dim), jnp.float32, -bound, bound)
        b = jax.random.uniform(next(ki), (1, out_dim), jnp.float32, -bound, bound)
        return w, b

    params = {}
    # shared trunk
    params["w1"], params["b1"] = linear(INPUT_DIM, HIDDEN_DIMS[0])
    params["g1"] = jnp.ones((1, HIDDEN_DIMS[0]), jnp.float32)
    params["be1"] = jnp.zeros((1, HIDDEN_DIMS[0]), jnp.float32)
    params["w2"], params["b2"] = linear(HIDDEN_DIMS[0], HIDDEN_DIMS[1])
    params["g2"] = jnp.ones((1, HIDDEN_DIMS[1]), jnp.float32)
    params["be2"] = jnp.zeros((1, HIDDEN_DIMS[1]), jnp.float32)
    # value head
    params["wv1"], params["bv1"] = linear(HIDDEN_DIMS[1], HEAD_DIM)
    params["wv2"], params["bv2"] = linear(HEAD_DIM, 1)
    # advantage head
    params["wa1"], params["ba1"] = linear(HIDDEN_DIMS[1], HEAD_DIM)
    params["wa2"], params["ba2"] = linear(HEAD_DIM, OUTPUT_DIM)
    return params


def reference_forward(x, p):
    """Pure-JAX reference matching the PyTorch forward (eval mode), unfused."""
    def ln(h, g, b):
        mu = jnp.mean(h, axis=-1, keepdims=True)
        var = jnp.mean((h - mu) ** 2, axis=-1, keepdims=True)
        return (h - mu) * jax.lax.rsqrt(var + LN_EPS) * g + b

    def gelu(h):
        return 0.5 * h * (1.0 + jax.lax.erf(h * (1.0 / math.sqrt(2.0))))

    h = x @ p["w1"] + p["b1"]
    h = gelu(ln(h, p["g1"], p["be1"]))
    h = h @ p["w2"] + p["b2"]
    h = gelu(ln(h, p["g2"], p["be2"]))
    v = gelu(h @ p["wv1"] + p["bv1"]) @ p["wv2"] + p["bv2"]
    a = gelu(h @ p["wa1"] + p["ba1"]) @ p["wa2"] + p["ba2"]
    return v + (a - jnp.mean(a, axis=1, keepdims=True))


if __name__ == "__main__":
    key = jax.random.PRNGKey(0)
    k_param, k_x = jax.random.split(key)

    params = init_params(k_param)

    # Small-batch case (inference-sized): tile = 16, grid = 1, no lane padding.
    B = 16
    x = jax.random.normal(k_x, (B, INPUT_DIM), jnp.float32)
    q_ref = reference_forward(x, params)

    # Exact path (f32 matmuls, erf GELU) -> correctness baseline, tight tolerance.
    fused_f32 = prepare_params(params, use_bf16_matmul=False)
    q = jax.block_until_ready(dueling_dqn_forward(x, fused_f32))
    assert q.shape == (B, OUTPUT_DIM)
    assert jnp.allclose(q, q_ref, atol=1e-4, rtol=1e-4), "f32 mismatch vs reference"

    # Multi-tile / padded-batch path (grid > 1, row padding sliced off).
    B2 = 300
    x2 = jax.random.normal(jax.random.PRNGKey(1), (B2, INPUT_DIM), jnp.float32)
    q2 = jax.block_until_ready(dueling_dqn_forward(x2, fused_f32))
    assert q2.shape == (B2, OUTPUT_DIM)
    assert jnp.allclose(q2, reference_forward(x2, params), atol=1e-4, rtol=1e-4), \
        "multi-tile f32 mismatch vs reference"

    # Fast path: bf16 matmuls (also the right choice on v5e) + bf16 GELU +
    # tanh-approx GELU (EUP). Loose tolerance vs the exact f32 reference.
    fused_bf16 = prepare_params(params, use_bf16_matmul=True)
    q_fast = jax.block_until_ready(
        dueling_dqn_forward(x, fused_bf16, bf16_activations=True, approx_gelu=True))
    assert q_fast.shape == (B, OUTPUT_DIM)
    assert bool(jnp.all(jnp.isfinite(q_fast)))
    assert float(jnp.max(jnp.abs(q_fast - q_ref))) < 0.15, "bf16 fast path diverged"

    print("KERNEL_OK")
</pallas_src>

<mosaic_0001>
module attributes {stable_mosaic.version = 11 : i64} {
  func.func @dueling_dqn_kernel(%arg0: i32, %arg1: memref<16x16xf32, #tpu.memory_space<vmem>>, %arg2: memref<16x256xf32, #tpu.memory_space<vmem>>, %arg3: memref<1x256xf32, #tpu.memory_space<vmem>>, %arg4: memref<1x256xf32, #tpu.memory_space<vmem>>, %arg5: memref<1x256xf32, #tpu.memory_space<vmem>>, %arg6: memref<256x256xf32, #tpu.memory_space<vmem>>, %arg7: memref<1x256xf32, #tpu.memory_space<vmem>>, %arg8: memref<1x256xf32, #tpu.memory_space<vmem>>, %arg9: memref<1x256xf32, #tpu.memory_space<vmem>>, %arg10: memref<256x256xf32, #tpu.memory_space<vmem>>, %arg11: memref<1x256xf32, #tpu.memory_space<vmem>>, %arg12: memref<256x4xf32, #tpu.memory_space<vmem>>, %arg13: memref<1x4xf32, #tpu.memory_space<vmem>>, %arg14: memref<16x4xf32, #tpu.memory_space<vmem>>) attributes {dimension_semantics = [#tpu.dimension_semantics<parallel>], iteration_bounds = array<i64: 1>, scalar_prefetch = 0 : i64, scratch_operands = 0 : i64, tpu.core_type = #tpu.core_type<tc>, window_params = [{transform_indices = @transform_0, window_bounds = array<i64: 16, 16>}, {pipeline_mode = #tpu.pipeline_mode<synchronous>, transform_indices = @transform_1, window_bounds = array<i64: 16, 256>}, {pipeline_mode = #tpu.pipeline_mode<synchronous>, transform_indices = @transform_2, window_bounds = array<i64: 1, 256>}, {pipeline_mode = #tpu.pipeline_mode<synchronous>, transform_indices = @transform_3, window_bounds = array<i64: 1, 256>}, {pipeline_mode = #tpu.pipeline_mode<synchronous>, transform_indices = @transform_4, window_bounds = array<i64: 1, 256>}, {pipeline_mode = #tpu.pipeline_mode<synchronous>, transform_indices = @transform_5, window_bounds = array<i64: 256, 256>}, {pipeline_mode = #tpu.pipeline_mode<synchronous>, transform_indices = @transform_6, window_bounds = array<i64: 1, 256>}, {pipeline_mode = #tpu.pipeline_mode<synchronous>, transform_indices = @transform_7, window_bounds = array<i64: 1, 256>}, {pipeline_mode = #tpu.pipeline_mode<synchronous>, transform_indices = @transform_8, window_bounds = array<i64: 1, 256>}, {pipeline_mode = #tpu.pipeline_mode<synchronous>, transform_indices = @transform_9, window_bounds = array<i64: 256, 256>}, {pipeline_mode = #tpu.pipeline_mode<synchronous>, transform_indices = @transform_10, window_bounds = array<i64: 1, 256>}, {pipeline_mode = #tpu.pipeline_mode<synchronous>, transform_indices = @transform_11, window_bounds = array<i64: 256, 4>}, {pipeline_mode = #tpu.pipeline_mode<synchronous>, transform_indices = @transform_12, window_bounds = array<i64: 1, 4>}, {transform_indices = @transform_13, window_bounds = array<i64: 16, 4>}]} {
    %c0 = arith.constant 0 : index
    %c0_0 = arith.constant 0 : index
    %0 = vector.load %arg1[%c0, %c0_0] : memref<16x16xf32, #tpu.memory_space<vmem>>, vector<16x16xf32>
    %c0_1 = arith.constant 0 : index
    %c0_2 = arith.constant 0 : index
    %1 = vector.load %arg2[%c0_1, %c0_2] : memref<16x256xf32, #tpu.memory_space<vmem>>, vector<16x256xf32>
    %cst = arith.constant dense<0.000000e+00> : vector<16x256xf32>
    %2 = tpu.matmul %0, %1, %cst {dimension_numbers = #tpu.dot_dimension_numbers<[1], [0], [0], [1], [0, 0, 1, 1], [], []>} : vector<16x16xf32>, vector<16x256xf32>, vector<16x256xf32> -> vector<16x256xf32>
    %c0_3 = arith.constant 0 : index
    %c0_4 = arith.constant 0 : index
    %3 = vector.load %arg3[%c0_3, %c0_4] : memref<1x256xf32, #tpu.memory_space<vmem>>, vector<1x256xf32>
    %4 = vector.broadcast %3 : vector<1x256xf32> to vector<16x256xf32>
    %5 = arith.addf %2, %4 : vector<16x256xf32>
    %c0_5 = arith.constant 0 : index
    %c0_6 = arith.constant 0 : index
    %6 = vector.load %arg4[%c0_5, %c0_6] : memref<1x256xf32, #tpu.memory_space<vmem>>, vector<1x256xf32>
    %c0_7 = arith.constant 0 : index
    %c0_8 = arith.constant 0 : index
    %7 = vector.load %arg5[%c0_7, %c0_8] : memref<1x256xf32, #tpu.memory_space<vmem>>, vector<1x256xf32>
    %cst_9 = arith.constant dense<0.000000e+00> : vector<16xf32>
    %8 = vector.multi_reduction <add>, %5, %cst_9 [1] : vector<16x256xf32> to vector<16xf32>
    %9 = vector.shape_cast %8 : vector<16xf32> to vector<16x1xf32>
    %cst_10 = arith.constant 2.560000e+02 : f32
    %10 = vector.broadcast %cst_10 : f32 to vector<16x1xf32>
    %11 = arith.divf %9, %10 : vector<16x1xf32>
    %12 = arith.mulf %5, %5 : vector<16x256xf32>
    %cst_11 = arith.constant dense<0.000000e+00> : vector<16xf32>
    %13 = vector.multi_reduction <add>, %12, %cst_11 [1] : vector<16x256xf32> to vector<16xf32>
    %14 = vector.shape_cast %13 : vector<16xf32> to vector<16x1xf32>
    %cst_12 = arith.constant 2.560000e+02 : f32
    %15 = vector.broadcast %cst_12 : f32 to vector<16x1xf32>
    %16 = arith.divf %14, %15 : vector<16x1xf32>
    %17 = arith.mulf %11, %11 : vector<16x1xf32>
    %18 = arith.subf %16, %17 : vector<16x1xf32>
    %cst_13 = arith.constant 9.99999974E-6 : f32
    %19 = vector.broadcast %cst_13 : f32 to vector<16x1xf32>
    %20 = arith.addf %18, %19 : vector<16x1xf32>
    %21 = math.rsqrt %20 : vector<16x1xf32>
    %22 = vector.broadcast %6 : vector<1x256xf32> to vector<16x256xf32>
    %23 = vector.broadcast %21 : vector<16x1xf32> to vector<16x256xf32>
    %24 = arith.mulf %22, %23 : vector<16x256xf32>
    %25 = vector.broadcast %11 : vector<16x1xf32> to vector<16x256xf32>
    %26 = arith.mulf %25, %24 : vector<16x256xf32>
    %27 = vector.broadcast %7 : vector<1x256xf32> to vector<16x256xf32>
    %28 = arith.subf %27, %26 : vector<16x256xf32>
    %29 = arith.mulf %5, %24 : vector<16x256xf32>
    %30 = arith.addf %29, %28 : vector<16x256xf32>
    %cst_14 = arith.constant 5.000000e-01 : f32
    %31 = vector.broadcast %cst_14 : f32 to vector<16x256xf32>
    %32 = arith.mulf %31, %30 : vector<16x256xf32>
    %cst_15 = arith.constant 0.707106769 : f32
    %33 = vector.broadcast %cst_15 : f32 to vector<16x256xf32>
    %34 = arith.mulf %30, %33 : vector<16x256xf32>
    %35 = math.erf %34 : vector<16x256xf32>
    %cst_16 = arith.constant 1.000000e+00 : f32
    %36 = vector.broadcast %cst_16 : f32 to vector<16x256xf32>
    %37 = arith.addf %36, %35 : vector<16x256xf32>
    %38 = arith.mulf %32, %37 : vector<16x256xf32>
    %c0_17 = arith.constant 0 : index
    %c0_18 = arith.constant 0 : index
    %39 = vector.load %arg6[%c0_17, %c0_18] : memref<256x256xf32, #tpu.memory_space<vmem>>, vector<256x256xf32>
    %cst_19 = arith.constant dense<0.000000e+00> : vector<16x256xf32>
    %40 = tpu.matmul %38, %39, %cst_19 {dimension_numbers = #tpu.dot_dimension_numbers<[1], [0], [0], [1], [0, 0, 1, 1], [], []>} : vector<16x256xf32>, vector<256x256xf32>, vector<16x256xf32> -> vector<16x256xf32>
    %c0_20 = arith.constant 0 : index
    %c0_21 = arith.constant 0 : index
    %41 = vector.load %arg7[%c0_20, %c0_21] : memref<1x256xf32, #tpu.memory_space<vmem>>, vector<1x256xf32>
    %42 = vector.broadcast %41 : vector<1x256xf32> to vector<16x256xf32>
    %43 = arith.addf %40, %42 : vector<16x256xf32>
    %c0_22 = arith.constant 0 : index
    %c0_23 = arith.constant 0 : index
    %44 = vector.load %arg8[%c0_22, %c0_23] : memref<1x256xf32, #tpu.memory_space<vmem>>, vector<1x256xf32>
    %c0_24 = arith.constant 0 : index
    %c0_25 = arith.constant 0 : index
    %45 = vector.load %arg9[%c0_24, %c0_25] : memref<1x256xf32, #tpu.memory_space<vmem>>, vector<1x256xf32>
    %cst_26 = arith.constant dense<0.000000e+00> : vector<16xf32>
    %46 = vector.multi_reduction <add>, %43, %cst_26 [1] : vector<16x256xf32> to vector<16xf32>
    %47 = vector.shape_cast %46 : vector<16xf32> to vector<16x1xf32>
    %cst_27 = arith.constant 2.560000e+02 : f32
    %48 = vector.broadcast %cst_27 : f32 to vector<16x1xf32>
    %49 = arith.divf %47, %48 : vector<16x1xf32>
    %50 = arith.mulf %43, %43 : vector<16x256xf32>
    %cst_28 = arith.constant dense<0.000000e+00> : vector<16xf32>
    %51 = vector.multi_reduction <add>, %50, %cst_28 [1] : vector<16x256xf32> to vector<16xf32>
    %52 = vector.shape_cast %51 : vector<16xf32> to vector<16x1xf32>
    %cst_29 = arith.constant 2.560000e+02 : f32
    %53 = vector.broadcast %cst_29 : f32 to vector<16x1xf32>
    %54 = arith.divf %52, %53 : vector<16x1xf32>
    %55 = arith.mulf %49, %49 : vector<16x1xf32>
    %56 = arith.subf %54, %55 : vector<16x1xf32>
    %cst_30 = arith.constant 9.99999974E-6 : f32
    %57 = vector.broadcast %cst_30 : f32 to vector<16x1xf32>
    %58 = arith.addf %56, %57 : vector<16x1xf32>
    %59 = math.rsqrt %58 : vector<16x1xf32>
    %60 = vector.broadcast %44 : vector<1x256xf32> to vector<16x256xf32>
    %61 = vector.broadcast %59 : vector<16x1xf32> to vector<16x256xf32>
    %62 = arith.mulf %60, %61 : vector<16x256xf32>
    %63 = vector.broadcast %49 : vector<16x1xf32> to vector<16x256xf32>
    %64 = arith.mulf %63, %62 : vector<16x256xf32>
    %65 = vector.broadcast %45 : vector<1x256xf32> to vector<16x256xf32>
    %66 = arith.subf %65, %64 : vector<16x256xf32>
    %67 = arith.mulf %43, %62 : vector<16x256xf32>
    %68 = arith.addf %67, %66 : vector<16x256xf32>
    %cst_31 = arith.constant 5.000000e-01 : f32
    %69 = vector.broadcast %cst_31 : f32 to vector<16x256xf32>
    %70 = arith.mulf %69, %68 : vector<16x256xf32>
    %cst_32 = arith.constant 0.707106769 : f32
    %71 = vector.broadcast %cst_32 : f32 to vector<16x256xf32>
    %72 = arith.mulf %68, %71 : vector<16x256xf32>
    %73 = math.erf %72 : vector<16x256xf32>
    %cst_33 = arith.constant 1.000000e+00 : f32
    %74 = vector.broadcast %cst_33 : f32 to vector<16x256xf32>
    %75 = arith.addf %74, %73 : vector<16x256xf32>
    %76 = arith.mulf %70, %75 : vector<16x256xf32>
    %c0_34 = arith.constant 0 : index
    %c0_35 = arith.constant 0 : index
    %77 = vector.load %arg10[%c0_34, %c0_35] : memref<256x256xf32, #tpu.memory_space<vmem>>, vector<256x256xf32>
    %cst_36 = arith.constant dense<0.000000e+00> : vector<16x256xf32>
    %78 = tpu.matmul %76, %77, %cst_36 {dimension_numbers = #tpu.dot_dimension_numbers<[1], [0], [0], [1], [0, 0, 1, 1], [], []>} : vector<16x256xf32>, vector<256x256xf32>, vector<16x256xf32> -> vector<16x256xf32>
    %c0_37 = arith.constant 0 : index
    %c0_38 = arith.constant 0 : index
    %79 = vector.load %arg11[%c0_37, %c0_38] : memref<1x256xf32, #tpu.memory_space<vmem>>, vector<1x256xf32>
    %80 = vector.broadcast %79 : vector<1x256xf32> to vector<16x256xf32>
    %81 = arith.addf %78, %80 : vector<16x256xf32>
    %cst_39 = arith.constant 5.000000e-01 : f32
    %82 = vector.broadcast %cst_39 : f32 to vector<16x256xf32>
    %83 = arith.mulf %82, %81 : vector<16x256xf32>
    %cst_40 = arith.constant 0.707106769 : f32
    %84 = vector.broadcast %cst_40 : f32 to vector<16x256xf32>
    %85 = arith.mulf %81, %84 : vector<16x256xf32>
    %86 = math.erf %85 : vector<16x256xf32>
    %cst_41 = arith.constant 1.000000e+00 : f32
    %87 = vector.broadcast %cst_41 : f32 to vector<16x256xf32>
    %88 = arith.addf %87, %86 : vector<16x256xf32>
    %89 = arith.mulf %83, %88 : vector<16x256xf32>
    %c0_42 = arith.constant 0 : index
    %c0_43 = arith.constant 0 : index
    %90 = vector.load %arg12[%c0_42, %c0_43] : memref<256x4xf32, #tpu.memory_space<vmem>>, vector<256x4xf32>
    %cst_44 = arith.constant dense<0.000000e+00> : vector<16x4xf32>
    %91 = tpu.matmul %89, %90, %cst_44 {dimension_numbers = #tpu.dot_dimension_numbers<[1], [0], [0], [1], [0, 0, 1, 1], [], []>} : vector<16x256xf32>, vector<256x4xf32>, vector<16x4xf32> -> vector<16x4xf32>
    %c0_45 = arith.constant 0 : index
    %c0_46 = arith.constant 0 : index
    %92 = vector.load %arg13[%c0_45, %c0_46] : memref<1x4xf32, #tpu.memory_space<vmem>>, vector<1x4xf32>
    %93 = vector.broadcast %92 : vector<1x4xf32> to vector<16x4xf32>
    %94 = arith.addf %91, %93 : vector<16x4xf32>
    %c0_47 = arith.constant 0 : index
    %c0_48 = arith.constant 0 : index
    %95 = vector.load %arg14[%c0_47, %c0_48] : memref<16x4xf32, #tpu.memory_space<vmem>>, vector<16x4xf32>
    tpu.vector_store %arg14[%c0_47, %c0_48], %94 {strides = array<i32>} : memref<16x4xf32, #tpu.memory_space<vmem>>, vector<16x4xf32>,
    return
  }
  func.func @transform_0(%arg0: i32) -> (i32, i32) {
    %c0_i32 = arith.constant 0 : i32
    %c0_i32_0 = arith.constant 0 : i32
    return %arg0, %c0_i32 : i32, i32
  }
  func.func @transform_1(%arg0: i32) -> (i32, i32) {
    %c0_i32 = arith.constant 0 : i32
    %c0_i32_0 = arith.constant 0 : i32
    %c0_i32_1 = arith.constant 0 : i32
    return %c0_i32, %c0_i32_0 : i32, i32
  }
  func.func @transform_2(%arg0: i32) -> (i32, i32) {
    %c0_i32 = arith.constant 0 : i32
    %c0_i32_0 = arith.constant 0 : i32
    %c0_i32_1 = arith.constant 0 : i32
    return %c0_i32, %c0_i32_0 : i32, i32
  }
  func.func @transform_3(%arg0: i32) -> (i32, i32) {
    %c0_i32 = arith.constant 0 : i32
    %c0_i32_0 = arith.constant 0 : i32
    %c0_i32_1 = arith.constant 0 : i32
    return %c0_i32, %c0_i32_0 : i32, i32
  }
  func.func @transform_4(%arg0: i32) -> (i32, i32) {
    %c0_i32 = arith.constant 0 : i32
    %c0_i32_0 = arith.constant 0 : i32
    %c0_i32_1 = arith.constant 0 : i32
    return %c0_i32, %c0_i32_0 : i32, i32
  }
  func.func @transform_5(%arg0: i32) -> (i32, i32) {
    %c0_i32 = arith.constant 0 : i32
    %c0_i32_0 = arith.constant 0 : i32
    %c0_i32_1 = arith.constant 0 : i32
    return %c0_i32, %c0_i32_0 : i32, i32
  }
  func.func @transform_6(%arg0: i32) -> (i32, i32) {
    %c0_i32 = arith.constant 0 : i32
    %c0_i32_0 = arith.constant 0 : i32
    %c0_i32_1 = arith.constant 0 : i32
    return %c0_i32, %c0_i32_0 : i32, i32
  }
  func.func @transform_7(%arg0: i32) -> (i32, i32) {
    %c0_i32 = arith.constant 0 : i32
    %c0_i32_0 = arith.constant 0 : i32
    %c0_i32_1 = arith.constant 0 : i32
    return %c0_i32, %c0_i32_0 : i32, i32
  }
  func.func @transform_8(%arg0: i32) -> (i32, i32) {
    %c0_i32 = arith.constant 0 : i32
    %c0_i32_0 = arith.constant 0 : i32
    %c0_i32_1 = arith.constant 0 : i32
    return %c0_i32, %c0_i32_0 : i32, i32
  }
  func.func @transform_9(%arg0: i32) -> (i32, i32) {
    %c0_i32 = arith.constant 0 : i32
    %c0_i32_0 = arith.constant 0 : i32
    %c0_i32_1 = arith.constant 0 : i32
    return %c0_i32, %c0_i32_0 : i32, i32
  }
  func.func @transform_10(%arg0: i32) -> (i32, i32) {
    %c0_i32 = arith.constant 0 : i32
    %c0_i32_0 = arith.constant 0 : i32
    %c0_i32_1 = arith.constant 0 : i32
    return %c0_i32, %c0_i32_0 : i32, i32
  }
  func.func @transform_11(%arg0: i32) -> (i32, i32) {
    %c0_i32 = arith.constant 0 : i32
    %c0_i32_0 = arith.constant 0 : i32
    %c0_i32_1 = arith.constant 0 : i32
    return %c0_i32, %c0_i32_0 : i32, i32
  }
  func.func @transform_12(%arg0: i32) -> (i32, i32) {
    %c0_i32 = arith.constant 0 : i32
    %c0_i32_0 = arith.constant 0 : i32
    %c0_i32_1 = arith.constant 0 : i32
    return %c0_i32, %c0_i32_0 : i32, i32
  }
  func.func @transform_13(%arg0: i32) -> (i32, i32) {
    %c0_i32 = arith.constant 0 : i32
    %c0_i32_0 = arith.constant 0 : i32
    return %arg0, %c0_i32 : i32, i32
  }
}

</mosaic_0001>

<bundles_post_ra>
// kernel: tpu_custom_call.1
= control target key start
LH: loop header
LB: loop body
LE: loop exit
PB: predicated region body
PF: predicated region fallthrough
CT: control target
= control target key end

     0   :  { %18 = vsyncpa [#allocation3], 0  ;;  %s1407_s0 = inlined_call_operand.vmem [shape: f32[16,16], index: 0, kind: input, shape index: {}]   ;;  %s1408_s1 = inlined_call_operand.vmem [shape: f32[16,256], index: 1, kind: input, shape index: {}]   ;;  %s1409_s2 = inlined_call_operand.vmem [shape: f32[1,256], index: 2, kind: input, shape index: {}]   ;;  %s1410_s3 = inlined_call_operand.vmem [shape: f32[1,256], index: 3, kind: input, shape index: {}]   ;;  %s1411_s4 = inlined_call_operand.vmem [shape: f32[1,256], index: 4, kind: input, shape index: {}]   ;;  %s1412_s5 = inlined_call_operand.hbm [shape: f32[256,256], index: 5, kind: input, shape index: {}]   ;;  %s1413_s6 = inlined_call_operand.vmem [shape: f32[1,256], index: 6, kind: input, shape index: {}]   ;;  %s1414_s7 = inlined_call_operand.vmem [shape: f32[1,256], index: 7, kind: input, shape index: {}]   ;;  %s1415_s8 = inlined_call_operand.vmem [shape: f32[1,256], index: 8, kind: input, shape index: {}]   ;;  %s1416_s9 = inlined_call_operand.hbm [shape: f32[256,256], index: 9, kind: input, shape index: {}]   ;;  %s1417_s10 = inlined_call_operand.vmem [shape: f32[1,256], index: 10, kind: input, shape index: {}]   ;;  %s1418_s11 = inlined_call_operand.vmem [shape: f32[256,4], index: 11, kind: input, shape index: {}]   ;;  %s1419_s12 = inlined_call_operand.vmem [shape: f32[1,4], index: 12, kind: input, shape index: {}]   ;;  %s1420_s13 = inlined_call_operand.vmem [shape: f32[16,4], index: 13, kind: output, shape index: {}]  }
   0x1   :  { %19 = vsyncpa [#allocation5], 0  ;;  %s1098_s25 = smov [#allocation2]   ;;  %s1050_s29 = scalar_lea.hbm %s1412_s5, 8192 }
   0x2   :  { %s35_s26 = sshll.u32 %s1098_s25, 4  ;;  %p1051_p0 = scmp.ne.s32.totalorder %s1412_s5, %s1050_s29  ;;  %s36_s26 = int_to_ptr.vmem [resolvable:$true] %s35_s26 }
   0x3   :  { %p1054_p1 = scmp.lt.u32.totalorder %s1050_s29, %s1412_s5 }
   0x5   :  { %p1056_p2 = pnand %p1054_p1, %p1051_p0 }
   0x7   :  { %1059 = shalt.err (!%p1056_p2)
}
   0x8   :  { %s1060_s17 = scalar_lea.vmem %s36_s26, 8192  ;;  %p1065_p4 = scmp.lt.s32.totalorder %s36_s26, %s36_s26 }
   0x9   :  { %p1061_p3 = scmp.ne.s32.totalorder %s36_s26, %s1060_s17  ;;  %p1066_p5 = scmp.lt.s32.totalorder %s1060_s17, %s1060_s17 }
   0xb   :  { %p1067_p6 = por %p1066_p5, %p1065_p4 }
   0xd   :  { %p1068_p7 = pnand %p1067_p6, %p1061_p3 }
   0xf   :  { %1071 = shalt.err (!%p1068_p7)
}
  0x10   :  { %s1099_s18 = smov 256   ;;  %s1100_s19 = smov 16  }
  0x11   :  { %41 = dma.hbm_to_vmem [thread:$0]  %s1412_s5, 8192, %s36_s26, [#allocation3], %s1099_s18, %s1099_s18, %s1100_s19  }
  0x12   :  { %s1101_s22 = smov [#allocation4]   ;;  %s1072_s27 = scalar_lea.hbm %s1416_s9, 8192 }
  0x13   :  { %s53_s23 = sshll.u32 %s1101_s22, 4  ;;  %p1073_p8 = scmp.ne.s32.totalorder %s1416_s9, %s1072_s27  ;;  %s54_s23 = int_to_ptr.vmem [resolvable:$true] %s53_s23 }
  0x14   :  { %p1076_p9 = scmp.lt.u32.totalorder %s1072_s27, %s1416_s9 }
  0x16   :  { %p1078_p10 = pnand %p1076_p9, %p1073_p8 }
  0x18   :  { %1081 = shalt.err (!%p1078_p10)
}
  0x19   :  { %s1082_s15 = scalar_lea.vmem %s54_s23, 8192  ;;  %p1087_p12 = scmp.lt.s32.totalorder %s54_s23, %s54_s23 }
  0x1a   :  { %p1083_p11 = scmp.ne.s32.totalorder %s54_s23, %s1082_s15  ;;  %p1088_p13 = scmp.lt.s32.totalorder %s1082_s15, %s1082_s15 }
  0x1c   :  { %p1089_p0 = por %p1088_p13, %p1087_p12 }
  0x1e   :  { %p1090_p1 = pnand %p1089_p0, %p1083_p11 }
  0x20   :  { %1093 = shalt.err (!%p1090_p1)
}
  0x21   :  { %59 = dma.hbm_to_vmem [thread:$0]  %s1416_s9, 8192, %s54_s23, [#allocation5], %s1099_s18, %s1099_s18, %s1100_s19  }
  0x22   :  { %1094 = dma.done.wait [#allocation3], 8192  }
  0x23   :  { %1095 = vsyncadd [#allocation3], 4294959104 }
  0x24   :  { %1096 = dma.done.wait [#allocation5], 8192  }
  0x25   :  { %1097 = vsyncadd [#allocation5], 4294959104  ;;  %v1102_v0 = vmov 0.0   ;;  %v75_v1 = vld [vmem:[%s1408_s1 + $0x8] sm:$0xff]  ;;  %v77_v2 = vld [vmem:[%s1408_s1 + $0x18] sm:$0xff]  ;;  %vm90_vm0 = vcmask 130048   ;;  %v80_v36 = vlaneseq }
  0x26   :  { %161 = vmatprep.mubr.f32.mxu0 %v1102_v0  ;;  %v74_v3 = vld [vmem:[%s1408_s1] sm:$0xff]  ;;  %v849_v4 = vpack.c.bf16 %v77_v2, %v75_v1  ;;  %v76_v5 = vld [vmem:[%s1408_s1 + $0x10] sm:$0xff]  ;;  %v73_v8 = vld [vmem:[%s1407_s0 + $0x8] sm:$0xff]  ;;  %vm799_vm1 = vcmask 31744  }
  0x27   :  { %v851_v6 = vpack.c.bf16 %v76_v5, %v74_v3  ;;  %v72_v7 = vld [vmem:[%s1407_s0] sm:$0xff]  ;;  %v268_v9 = vld [vmem:[#allocation2 + $0x8] sm:$0xff]  ;;  %v270_v10 = vld [vmem:[#allocation2 + $0x18] sm:$0xff]  ;;  %v81_v37 = vshrl.u32 %v80_v36, 7 }
  0x28   :  { %850 = vmatprep.subr.bf16.mxu0 %v849_v4  ;;  %v267_v11 = vld [vmem:[#allocation2] sm:$0xff]  ;;  %v853_v12 = vpack.c.bf16 %v270_v10, %v268_v9  ;;  %v269_v13 = vld [vmem:[#allocation2 + $0x10] sm:$0xff]  ;;  %v272_v14 = vld [vmem:[#allocation2 + $0x28] sm:$0xff] }
  0x29   :  { %852 = vmatpush1.bf16.msra.mxu0 %v851_v6  ;;  %v274_v15 = vld [vmem:[#allocation2 + $0x38] sm:$0xff]  ;;  %v855_v16 = vpack.c.bf16 %v269_v13, %v267_v11  ;;  %v271_v18 = vld [vmem:[#allocation2 + $0x20] sm:$0xff]  ;;  %v273_v19 = vld [vmem:[#allocation2 + $0x30] sm:$0xff]  ;;  %v1215_v38 = vsub.s32 0, %v81_v37  ;;  %v1220_v40 = vsub.s32 1, %v81_v37 }
  0x2a   :  { %v857_v17 = vpack.c.bf16 %v274_v15, %v272_v14  ;;  %v276_v20 = vld [vmem:[#allocation2 + $0x48] sm:$0xff]  ;;  %854 = vmatprep.subr.bf16.mxu1 %v853_v12  ;;  %v278_v21 = vld [vmem:[#allocation2 + $0x58] sm:$0xff]  ;;  %v859_v22 = vpack.c.bf16 %v273_v19, %v271_v18  ;;  %v275_v24 = vld [vmem:[#allocation2 + $0x40] sm:$0xff] }
  0x2b   :  { %856 = vmatpush1.bf16.msra.mxu1 %v855_v16  ;;  %v861_v23 = vpack.c.bf16 %v278_v21, %v276_v20  ;;  %v277_v25 = vld [vmem:[#allocation2 + $0x50] sm:$0xff]  ;;  %v280_v26 = vld [vmem:[#allocation2 + $0x68] sm:$0xff]  ;;  %v282_v27 = vld [vmem:[#allocation2 + $0x78] sm:$0xff] }
  0x2c   :  { %808 = vmatmul.mubr.msk.f32.vlgmr.msra.gmra.mrb[0].mxu0 %vm90_vm0, %v72_v7  ;;  %858 = vmatprep.subr.bf16.mxu1 %v857_v17  ;;  %v863_v28 = vpack.c.bf16 %v277_v25, %v275_v24  ;;  %v865_v29 = vpack.c.bf16 %v282_v27, %v280_v26  ;;  %v279_v30 = vld [vmem:[#allocation2 + $0x60] sm:$0xff]  ;;  %v281_v31 = vld [vmem:[#allocation2 + $0x70] sm:$0xff]  ;;  %v284_v32 = vld [vmem:[#allocation2 + $0x88] sm:$0xff] }
  0x2d   :  { %167 = vmatprep.mubr.f32.mxu0 %v1102_v0  ;;  %v286_v33 = vld [vmem:[#allocation2 + $0x98] sm:$0xff]  ;;  %v867_v34 = vpack.c.bf16 %v281_v31, %v279_v30  ;;  %v78_v39 = vld [vmem:[%s1409_s2] sm:$0x3]  ;;  %v285_v60 = vld [vmem:[#allocation2 + $0x90] sm:$0xff] }
  0x2e   :  { %v869_v35 = vpack.c.bf16 %v286_v33, %v284_v32  ;;  %v83_v41 = vrot.slane %v78_v39, %v1215_v38  ;;  %v87_v42 = vrot.slane %v78_v39, %v1220_v40  ;;  %v283_v59 = vld [vmem:[#allocation2 + $0x80] sm:$0xff]  ;;  %v288_v62 = vld [vmem:[#allocation2 + $0xa8] sm:$0xff]  ;;  %v290_v63 = vld [vmem:[#allocation2 + $0xb8] sm:$0xff] }
  0x2f   :  { %860 = vmatpush1.bf16.msra.mxu1 %v859_v22  ;;  %v871_v61 = vpack.c.bf16 %v285_v60, %v283_v59  ;;  %v873_v0 = vpack.c.bf16 %v290_v63, %v288_v62  ;;  %v287_v1 = vld [vmem:[#allocation2 + $0xa0] sm:$0xff]  ;;  %v289_v2 = vld [vmem:[#allocation2 + $0xb0] sm:$0xff]  ;;  %v292_v4 = vld [vmem:[#allocation2 + $0xc8] sm:$0xff] }
  0x30   :  { %809 = vmatmul.mubr.msk.f32.gmra.mrb[2].mxu0 %vm90_vm0, %v73_v8  ;;  %862 = vmatprep.subr.bf16.mxu1 %v861_v23  ;;  %v875_v3 = vpack.c.bf16 %v289_v2, %v287_v1  ;;  %v294_v5 = vld [vmem:[#allocation2 + $0xd8] sm:$0xff]  ;;  %v291_v7 = vld [vmem:[#allocation2 + $0xc0] sm:$0xff]  ;;  %v293_v8 = vld [vmem:[#allocation2 + $0xd0] sm:$0xff] }
  0x31   :  { %v877_v6 = vpack.c.bf16 %v294_v5, %v292_v4  ;;  %v879_v9 = vpack.c.bf16 %v293_v8, %v291_v7  ;;  %v296_v10 = vld [vmem:[#allocation2 + $0xe8] sm:$0xff]  ;;  %v298_v11 = vld [vmem:[#allocation2 + $0xf8] sm:$0xff]  ;;  %v295_v13 = vld [vmem:[#allocation2 + $0xe0] sm:$0xff] }
  0x32   :  { %v881_v12 = vpack.c.bf16 %v298_v11, %v296_v10  ;;  %v297_v14 = vld [vmem:[#allocation2 + $0xf0] sm:$0xff]  ;;  %v300_v16 = vld [vmem:[#allocation2 + $0x108] sm:$0xff]  ;;  %v302_v17 = vld [vmem:[#allocation2 + $0x118] sm:$0xff] }
  0x33   :  { %864 = vmatpush1.bf16.msra.mxu1 %v863_v28  ;;  %v883_v15 = vpack.c.bf16 %v297_v14, %v295_v13  ;;  %v885_v18 = vpack.c.bf16 %v302_v17, %v300_v16  ;;  %v299_v19 = vld [vmem:[#allocation2 + $0x100] sm:$0xff]  ;;  %v301_v20 = vld [vmem:[#allocation2 + $0x110] sm:$0xff]  ;;  %v304_v22 = vld [vmem:[#allocation2 + $0x128] sm:$0xff] }
  0x34   :  { %866 = vmatprep.subr.bf16.mxu1 %v865_v29  ;;  %v887_v21 = vpack.c.bf16 %v301_v20, %v299_v19  ;;  %v306_v23 = vld [vmem:[#allocation2 + $0x138] sm:$0xff]  ;;  %v303_v24 = vld [vmem:[#allocation2 + $0x120] sm:$0xff]  ;;  %v305_v26 = vld [vmem:[#allocation2 + $0x130] sm:$0xff] }
  0x35   :  { %v889_v25 = vpack.c.bf16 %v306_v23, %v304_v22  ;;  %v308_v27 = vld [vmem:[#allocation2 + $0x148] sm:$0xff]  ;;  %v310_v28 = vld [vmem:[#allocation2 + $0x158] sm:$0xff]  ;;  %v891_v29 = vpack.c.bf16 %v305_v26, %v303_v24  ;;  %v307_v31 = vld [vmem:[#allocation2 + $0x140] sm:$0xff] }
  0x36   :  { %v893_v30 = vpack.c.bf16 %v310_v28, %v308_v27  ;;  %v309_v32 = vld [vmem:[#allocation2 + $0x150] sm:$0xff]  ;;  %v312_v33 = vld [vmem:[#allocation2 + $0x168] sm:$0xff]  ;;  %v311_v37 = vld [vmem:[#allocation2 + $0x160] sm:$0xff] }
  0x37   :  { %868 = vmatpush1.bf16.msra.mxu1 %v867_v34  ;;  %v314_v34 = vld [vmem:[#allocation2 + $0x178] sm:$0xff]  ;;  %v313_v39 = vld [vmem:[#allocation2 + $0x170] sm:$0xff]  ;;  %v328_v63 = vld [vmem:[#allocation2 + $0x1e8] sm:$0xff] }
  0x38   :  { %870 = vmatprep.subr.bf16.mxu1 %v869_v35  ;;  %v895_v35 = vpack.c.bf16 %v309_v32, %v307_v31  ;;  %v897_v36 = vpack.c.bf16 %v314_v34, %v312_v33  ;;  %v325_v62 = vld [vmem:[#allocation2 + $0x1d0] sm:$0xff]  ;;  %v174_v20 = vld [vmem:[%s1410_s3] sm:$0x3] }
  0x39   :  { %v329_v4 = vld [vmem:[#allocation2 + $0x1f0] sm:$0xff]  ;;  %v213_v22 = vrot.slane %v174_v20, %v1220_v40  ;;  %v175_v23 = vld [vmem:[%s1411_s4] sm:$0x3] }
  0x3a   :  { %v228_v26 = vrot.slane %v175_v23, %v1215_v38  ;;  %v232_v27 = vrot.slane %v175_v23, %v1220_v40  ;;  %v525_v23 = vld [vmem:[#allocation4 + $0x68] sm:$0xff] }
  0x3b   :  { %872 = vmatpush1.bf16.msra.mxu1 %v871_v61  ;;  %v323_v61 = vld [vmem:[#allocation2 + $0x1c0] sm:$0xff] }
  0x3c   :  { %874 = vmatprep.subr.bf16.mxu1 %v873_v0  ;;  %v330_v0 = vld [vmem:[#allocation2 + $0x1f8] sm:$0xff]  ;;  %v911_v1 = vpack.c.bf16 %v325_v62, %v323_v61 }
  0x3d   :  { %v913_v2 = vpack.c.bf16 %v330_v0, %v328_v63 }
  0x3f   :  { %876 = vmatpush1.bf16.msra.mxu1 %v875_v3  ;;  %v327_v3 = vld [vmem:[#allocation2 + $0x1e0] sm:$0xff] }
  0x40   :  { %878 = vmatprep.subr.bf16.mxu1 %v877_v6  ;;  %v915_v5 = vpack.c.bf16 %v329_v4, %v327_v3 }
  0x43   :  { %880 = vmatpush1.bf16.msra.mxu1 %v879_v9 }
  0x44   :  { %882 = vmatprep.subr.bf16.mxu1 %v881_v12 }
  0x47   :  { %884 = vmatpush1.bf16.msra.mxu1 %v883_v15 }
  0x48   :  { %886 = vmatprep.subr.bf16.mxu1 %v885_v18 }
  0x4b   :  { %888 = vmatpush1.bf16.msra.mxu1 %v887_v21  ;;  %v209_v21 = vrot.slane %v174_v20, %v1215_v38 }
  0x4c   :  { %890 = vmatprep.subr.bf16.mxu1 %v889_v25 }
  0x4f   :  { %892 = vmatpush1.bf16.msra.mxu1 %v891_v29 }
  0x50   :  { %894 = vmatprep.subr.bf16.mxu1 %v893_v30 }
  0x53   :  { %896 = vmatpush1.bf16.msra.mxu1 %v895_v35 }
  0x54   :  { %898 = vmatprep.subr.bf16.mxu1 %v897_v36 }
  0xff   :  { %v163_v43 = vpop.f32.mrb[0].mxu0 }
 0x100   :  { %v1224_v44 = vadd.f32 %v163_v43, %v83_v41  ;;  %v165_v45 = vpop.f32.mrb[1].mxu0  ;;  %v899_v43 = vpack.c.bf16 %v313_v39, %v311_v37 }
 0x101   :  { %v1226_v46 = vadd.f32 %v165_v45, %v87_v42 }
 0x102   :  { %v185_v49 = vmul.f32 %v1224_v44, %v1224_v44  ;;  %900 = vmatpush1.bf16.msra.mxu1 %v899_v43 }
 0x103   :  { %v169_v47 = vpop.f32.mrb[2].mxu0  ;;  %v176_v48 = vadd.f32 %v1226_v46, %v1224_v44  ;;  %v186_v50 = vmul.f32 %v1226_v46, %v1226_v46 }
 0x104   :  { %v1234_v51 = vadd.f32 %v169_v47, %v83_v41  ;;  %v171_v52 = vpop.f32.mrb[3].mxu0  ;;  %v316_v41 = vld [vmem:[#allocation2 + $0x188] sm:$0xff]  ;;  %v315_v47 = vld [vmem:[#allocation2 + $0x180] sm:$0xff] }
 0x105   :  { %v1236_v53 = vadd.f32 %v171_v52, %v87_v42  ;;  %177 = vadd.xlane.f32.xlu0 %v176_v48  ;;  %v189_v55 = vadd.f32 %v186_v50, %v185_v49  ;;  %v318_v42 = vld [vmem:[#allocation2 + $0x198] sm:$0xff]  ;;  %v317_v48 = vld [vmem:[#allocation2 + $0x190] sm:$0xff]  ;;  %v320_v49 = vld [vmem:[#allocation2 + $0x1a8] sm:$0xff] }
 0x106   :  { %v187_v56 = vmul.f32 %v1234_v51, %v1234_v51  ;;  %v901_v45 = vpack.c.bf16 %v318_v42, %v316_v41  ;;  %v322_v50 = vld [vmem:[#allocation2 + $0x1b8] sm:$0xff]  ;;  %v903_v52 = vpack.c.bf16 %v317_v48, %v315_v47 }
 0x107   :  { %v179_v54 = vadd.f32 %v1236_v53, %v1234_v51  ;;  %v188_v57 = vmul.f32 %v1236_v53, %v1236_v53 }
 0x108   :  { %902 = vmatprep.subr.bf16.mxu1 %v901_v45 }
 0x109   :  { %180 = vadd.xlane.f32.xlu1 %v179_v54  ;;  %190 = vadd.xlane.f32.xlu0 %v189_v55  ;;  %v192_v58 = vadd.f32 %v188_v57, %v187_v56  ;;  %v905_v54 = vpack.c.bf16 %v322_v50, %v320_v49  ;;  %v319_v55 = vld [vmem:[#allocation2 + $0x1a0] sm:$0xff]  ;;  %v321_v56 = vld [vmem:[#allocation2 + $0x1b0] sm:$0xff]  ;;  %v324_v57 = vld [vmem:[#allocation2 + $0x1c8] sm:$0xff] }
 0x10a   :  { %904 = vmatpush1.bf16.msra.mxu1 %v903_v52  ;;  %v907_v59 = vpack.c.bf16 %v321_v56, %v319_v55 }
 0x10b   :  { %906 = vmatprep.subr.bf16.mxu1 %v905_v54 }
 0x10d   :  { %193 = vadd.xlane.f32.xlu1 %v192_v58  ;;  %v326_v58 = vld [vmem:[#allocation2 + $0x1d8] sm:$0xff] }
 0x10e   :  { %v909_v60 = vpack.c.bf16 %v326_v58, %v324_v57  ;;  %908 = vmatpush1.bf16.msra.mxu1 %v907_v59 }
 0x110   :  { %910 = vmatprep.subr.bf16.mxu1 %v909_v60 }
 0x112   :  { %912 = vmatpush1.bf16.msra.mxu1 %v911_v1 }
 0x113   :  { %914 = vmatprep.subr.bf16.mxu1 %v913_v2 }
 0x116   :  { %916 = vmatpush1.bf16.msra.mxu1 %v915_v5 }
 0x192   :  { %v178_v6 = vpop.xlane.xlu0 %177 }
 0x193   :  { %v183_v7 = vmul.f32 0.00390625, %v178_v6  ;;  %v513_v6 = vld [vmem:[#allocation4 + $0x8] sm:$0xff] }
 0x195   :  { %v197_v11 = vmul.f32 %v183_v7, %v183_v7 }
 0x196   :  { %v181_v8 = vpop.xlane.xlu1 %180  ;;  %v191_v9 = vpop.xlane.xlu0 %190 }
 0x197   :  { %v184_v10 = vmul.f32 0.00390625, %v181_v8  ;;  %v195_v12 = vmul.f32 0.00390625, %v191_v9  ;;  %v512_v8 = vld [vmem:[#allocation4] sm:$0xff] }
 0x199   :  { %v199_v13 = vsub.f32 %v195_v12, %v197_v11  ;;  %v198_v16 = vmul.f32 %v184_v10, %v184_v10  ;;  %v517_v11 = vld [vmem:[#allocation4 + $0x28] sm:$0xff]  ;;  %v519_v12 = vld [vmem:[#allocation4 + $0x38] sm:$0xff] }
 0x19a   :  { %v194_v14 = vpop.xlane.xlu1 %193 }
 0x19b   :  { %v201_v15 = vadd.f32 1e-05, %v199_v13  ;;  %v196_v17 = vmul.f32 0.00390625, %v194_v14  ;;  %v921_v14 = vpack.c.bf16 %v519_v12, %v517_v11  ;;  %v545_v11 = vld [vmem:[#allocation4 + $0x108] sm:$0xff]  ;;  %v547_v12 = vld [vmem:[#allocation4 + $0x118] sm:$0xff] }
 0x19d   :  { %1018 = vrsqrt.f32 %v201_v15  ;;  %v200_v18 = vsub.f32 %v196_v17, %v198_v16  ;;  %v516_v15 = vld [vmem:[#allocation4 + $0x20] sm:$0xff]  ;;  %v518_v16 = vld [vmem:[#allocation4 + $0x30] sm:$0xff]  ;;  %v521_v17 = vld [vmem:[#allocation4 + $0x48] sm:$0xff] }
 0x19f   :  { %v202_v19 = vadd.f32 1e-05, %v200_v18  ;;  %v523_v18 = vld [vmem:[#allocation4 + $0x58] sm:$0xff] }
 0x1a0   :  { %v925_v20 = vpack.c.bf16 %v523_v18, %v521_v17  ;;  %v549_v17 = vld [vmem:[#allocation4 + $0x128] sm:$0xff]  ;;  %v551_v18 = vld [vmem:[#allocation4 + $0x138] sm:$0xff] }
 0x1a1   :  { %1020 = vrsqrt.f32 %v202_v19  ;;  %v923_v19 = vpack.c.bf16 %v518_v16, %v516_v15  ;;  %v546_v15 = vld [vmem:[#allocation4 + $0x110] sm:$0xff] }
 0x1a7   :  { %v1019_v24 = vpop.eup %1018 }
 0x1a8   :  { %v217_v25 = vmul.f32 %v1019_v24, %v213_v22  ;;  %v216_v28 = vmul.f32 %v1019_v24, %v209_v21  ;;  %v527_v24 = vld [vmem:[#allocation4 + $0x78] sm:$0xff] }
 0x1aa   :  { %v221_v29 = vmul.f32 %v217_v25, %v183_v7  ;;  %v220_v30 = vmul.f32 %v216_v28, %v183_v7  ;;  %v240_v32 = vmul.f32 %v217_v25, %v1226_v46  ;;  %v239_v33 = vmul.f32 %v216_v28, %v1224_v44  ;;  %v515_v7 = vld [vmem:[#allocation4 + $0x18] sm:$0xff]  ;;  %v526_v28 = vld [vmem:[#allocation4 + $0x70] sm:$0xff] }
 0x1ab   :  { %v1021_v31 = vpop.eup %1020  ;;  %v917_v9 = vpack.c.bf16 %v515_v7, %v513_v6  ;;  %v543_v6 = vld [vmem:[#allocation4 + $0xf8] sm:$0xff] }
 0x1ac   :  { %v236_v34 = vsub.f32 %v232_v27, %v221_v29  ;;  %v235_v35 = vsub.f32 %v228_v26, %v220_v30  ;;  %v219_v36 = vmul.f32 %v1021_v31, %v213_v22  ;;  %v218_v37 = vmul.f32 %v1021_v31, %v209_v21  ;;  %v520_v21 = vld [vmem:[#allocation4 + $0x40] sm:$0xff]  ;;  %v522_v22 = vld [vmem:[#allocation4 + $0x50] sm:$0xff]  ;;  %v529_v29 = vld [vmem:[#allocation4 + $0x88] sm:$0xff] }
 0x1ad   :  { %918 = vmatprep.subr.bf16.mxu0 %v917_v9  ;;  %v927_v25 = vpack.c.bf16 %v522_v22, %v520_v21  ;;  %v531_v30 = vld [vmem:[#allocation4 + $0x98] sm:$0xff]  ;;  %v542_v9 = vld [vmem:[#allocation4 + $0xf0] sm:$0xff] }
 0x1ae   :  { %v244_v39 = vadd.f32 %v240_v32, %v236_v34  ;;  %v243_v41 = vadd.f32 %v239_v33, %v235_v35  ;;  %v223_v42 = vmul.f32 %v219_v36, %v184_v10  ;;  %v222_v43 = vmul.f32 %v218_v37, %v184_v10  ;;  %v514_v10 = vld [vmem:[#allocation4 + $0x10] sm:$0xff]  ;;  %v528_v33 = vld [vmem:[#allocation4 + $0x80] sm:$0xff] }
 0x1af   :  { %v242_v49 = vmul.f32 %v219_v36, %v1236_v53  ;;  %v241_v52 = vmul.f32 %v218_v37, %v1234_v51  ;;  %v919_v13 = vpack.c.bf16 %v514_v10, %v512_v8  ;;  %v933_v32 = vpack.c.bf16 %v531_v30, %v529_v29  ;;  %v530_v34 = vld [vmem:[#allocation4 + $0x90] sm:$0xff]  ;;  %v331_v36 = vld [vmem:[%s1413_s6] sm:$0x3]  ;;  %v559_v30 = vld [vmem:[#allocation4 + $0x178] sm:$0xff] }
 0x1b0   :  { %v252_v45 = vmul.f32 0.70710677, %v244_v39  ;;  %v251_v47 = vmul.f32 0.70710677, %v243_v41  ;;  %v238_v48 = vsub.f32 %v232_v27, %v223_v42  ;;  %v237_v50 = vsub.f32 %v228_v26, %v222_v43  ;;  %v524_v27 = vld [vmem:[#allocation4 + $0x60] sm:$0xff]  ;;  %v550_v21 = vld [vmem:[#allocation4 + $0x130] sm:$0xff] }
 0x1b1   :  { %v248_v58 = vmul.f32 0.5, %v244_v39  ;;  %v247_v60 = vmul.f32 0.5, %v243_v41  ;;  %920 = vmatpush1.bf16.msra.mxu0 %v919_v13  ;;  %v929_v26 = vpack.c.bf16 %v527_v24, %v525_v23  ;;  %v931_v31 = vpack.c.bf16 %v526_v28, %v524_v27  ;;  %v540_v8 = vld [vmem:[#allocation4 + $0xe0] sm:$0xff]  ;;  %v553_v23 = vld [vmem:[#allocation4 + $0x148] sm:$0xff]  ;;  %v555_v24 = vld [vmem:[#allocation4 + $0x158] sm:$0xff] }
 0x1b2   :  { %1022 = verf.f32 %v252_v45  ;;  %v246_v46 = vadd.f32 %v242_v49, %v238_v48  ;;  %v245_v44 = vadd.f32 %v241_v52, %v237_v50  ;;  %922 = vmatprep.subr.bf16.mxu0 %v921_v14  ;;  %v935_v35 = vpack.c.bf16 %v530_v34, %v528_v33  ;;  %v544_v14 = vld [vmem:[#allocation4 + $0x100] sm:$0xff]  ;;  %v554_v27 = vld [vmem:[#allocation4 + $0x150] sm:$0xff]  ;;  %v557_v28 = vld [vmem:[#allocation4 + $0x168] sm:$0xff] }
 0x1b3   :  { %1024 = verf.f32 %v251_v47  ;;  %v336_v37 = vrot.slane %v331_v36, %v1215_v38  ;;  %v340_v39 = vrot.slane %v331_v36, %v1220_v40  ;;  %v947_v10 = vpack.c.bf16 %v542_v9, %v540_v8  ;;  %v561_v34 = vld [vmem:[#allocation4 + $0x188] sm:$0xff] }
 0x1b4   :  { %v254_v54 = vmul.f32 0.70710677, %v246_v46  ;;  %v253_v55 = vmul.f32 0.70710677, %v245_v44  ;;  %v250_v51 = vmul.f32 0.5, %v246_v46  ;;  %v249_v2 = vmul.f32 0.5, %v245_v44 }
 0x1b5   :  { %924 = vmatpush1.bf16.msra.mxu0 %v923_v19  ;;  %v949_v13 = vpack.c.bf16 %v547_v12, %v545_v11  ;;  %v951_v16 = vpack.c.bf16 %v546_v15, %v544_v14  ;;  %v953_v19 = vpack.c.bf16 %v551_v18, %v549_v17  ;;  %v961_v33 = vpack.c.bf16 %v559_v30, %v557_v28  ;;  %v688_v11 = vld [vmem:[%s1418_s11 + $0x18] sm:$0xff]  ;;  %v705_v12 = vld [vmem:[%s1418_s11 + $0xa0] sm:$0xff]  ;;  %v690_v17 = vld [vmem:[%s1418_s11 + $0x28] sm:$0xff] }
 0x1b6   :  { %1026 = verf.f32 %v254_v54  ;;  %926 = vmatprep.subr.bf16.mxu0 %v925_v20  ;;  %v548_v20 = vld [vmem:[#allocation4 + $0x120] sm:$0xff] }
 0x1b7   :  { %1028 = verf.f32 %v253_v55  ;;  %v955_v22 = vpack.c.bf16 %v550_v21, %v548_v20 }
 0x1b9   :  { %928 = vmatpush1.bf16.msra.mxu0 %v927_v25  ;;  %v957_v25 = vpack.c.bf16 %v555_v24, %v553_v23 }
 0x1ba   :  { %930 = vmatprep.subr.bf16.mxu0 %v929_v26  ;;  %v552_v26 = vld [vmem:[#allocation4 + $0x140] sm:$0xff] }
 0x1bb   :  { %v959_v29 = vpack.c.bf16 %v554_v27, %v552_v26 }
 0x1bc   :  { %v1023_v56 = vpop.eup %1022 }
 0x1bd   :  { %v1025_v57 = vpop.eup %1024  ;;  %v260_v59 = vadd.f32 1.0, %v1023_v56  ;;  %932 = vmatpush1.bf16.msra.mxu0 %v931_v31  ;;  %v556_v31 = vld [vmem:[#allocation4 + $0x160] sm:$0xff] }
 0x1be   :  { %v259_v61 = vadd.f32 1.0, %v1025_v57  ;;  %934 = vmatprep.subr.bf16.mxu0 %v933_v32  ;;  %v558_v32 = vld [vmem:[#allocation4 + $0x170] sm:$0xff] }
 0x1bf   :  { %v264_v62 = vmul.f32 %v260_v59, %v248_v58  ;;  %v533_v59 = vld [vmem:[#allocation4 + $0xa8] sm:$0xff]  ;;  %v963_v36 = vpack.c.bf16 %v558_v32, %v556_v31 }
 0x1c0   :  { %v263_v63 = vmul.f32 %v259_v61, %v247_v60  ;;  %v1027_v53 = vpop.eup %1026  ;;  %v535_v60 = vld [vmem:[#allocation4 + $0xb8] sm:$0xff] }
 0x1c1   :  { %407 = vmatprep.mubr.f32.mxu1 %v264_v62  ;;  %v1029_v0 = vpop.eup %1028  ;;  %v262_v1 = vadd.f32 1.0, %v1027_v53  ;;  %936 = vmatpush1.bf16.msra.mxu0 %v935_v35  ;;  %v937_v61 = vpack.c.bf16 %v535_v60, %v533_v59  ;;  %v532_v62 = vld [vmem:[#allocation4 + $0xa0] sm:$0xff]  ;;  %v563_v35 = vld [vmem:[#allocation4 + $0x198] sm:$0xff]  ;;  %v570_v59 = vld [vmem:[#allocation4 + $0x1d0] sm:$0xff] }
 0x1c2   :  { %408 = vmatmul.mubr.f32.vlgmr.msra.gmra.mrb[0].mxu1 %v263_v63  ;;  %v261_v3 = vadd.f32 1.0, %v1029_v0  ;;  %v534_v63 = vld [vmem:[#allocation4 + $0xb0] sm:$0xff]  ;;  %v537_v0 = vld [vmem:[#allocation4 + $0xc8] sm:$0xff] }
 0x1c3   :  { %v266_v4 = vmul.f32 %v262_v1, %v250_v51  ;;  %v939_v53 = vpack.c.bf16 %v534_v63, %v532_v62  ;;  %938 = vmatprep.subr.bf16.mxu0 %v937_v61  ;;  %v539_v51 = vld [vmem:[#allocation4 + $0xd8] sm:$0xff]  ;;  %v573_v60 = vld [vmem:[#allocation4 + $0x1e8] sm:$0xff] }
 0x1c4   :  { %v265_v5 = vmul.f32 %v261_v3, %v249_v2  ;;  %v941_v1 = vpack.c.bf16 %v539_v51, %v537_v0  ;;  %v536_v2 = vld [vmem:[#allocation4 + $0xc0] sm:$0xff]  ;;  %v538_v3 = vld [vmem:[#allocation4 + $0xd0] sm:$0xff]  ;;  %v575_v61 = vld [vmem:[#allocation4 + $0x1f8] sm:$0xff] }
 0x1c5   :  { %413 = vmatprep.mubr.f32.mxu1 %v266_v4  ;;  %940 = vmatpush1.bf16.msra.mxu0 %v939_v53  ;;  %v943_v4 = vpack.c.bf16 %v538_v3, %v536_v2  ;;  %v977_v63 = vpack.c.bf16 %v575_v61, %v573_v60  ;;  %v572_v53 = vld [vmem:[#allocation4 + $0x1e0] sm:$0xff]  ;;  %v574_v0 = vld [vmem:[#allocation4 + $0x1f0] sm:$0xff]  ;;  %v702_v2 = vld [vmem:[%s1418_s11 + $0x88] sm:$0xff] }
 0x1c6   :  { %414 = vmatmul.mubr.f32.gmra.mrb[2].mxu1 %v265_v5  ;;  %942 = vmatprep.subr.bf16.mxu0 %v941_v1  ;;  %v541_v5 = vld [vmem:[#allocation4 + $0xe8] sm:$0xff]  ;;  %v979_v51 = vpack.c.bf16 %v574_v0, %v572_v53  ;;  %v701_v1 = vld [vmem:[%s1418_s11 + $0x80] sm:$0xff] }
 0x1c7   :  { %v945_v7 = vpack.c.bf16 %v543_v6, %v541_v5  ;;  %v685_v3 = vld [vmem:[%s1418_s11] sm:$0xff]  ;;  %v686_v5 = vld [vmem:[%s1418_s11 + $0x8] sm:$0xff]  ;;  %v703_v6 = vld [vmem:[%s1418_s11 + $0x90] sm:$0xff] }
 0x1c8   :  { %v983_v8 = vpack.c.bf16 %v686_v5, %v685_v3 }
 0x1c9   :  { %944 = vmatpush1.bf16.msra.mxu0 %v943_v4  ;;  %v981_v4 = vpack.c.bf16 %v702_v2, %v701_v1 }
 0x1ca   :  { %946 = vmatprep.subr.bf16.mxu0 %v945_v7  ;;  %v704_v7 = vld [vmem:[%s1418_s11 + $0x98] sm:$0xff] }
 0x1cb   :  { %v985_v9 = vpack.c.bf16 %v704_v7, %v703_v6  ;;  %982 = vmatprep.subr.bf16.mxu1 %v981_v4 }
 0x1cc   :  { %984 = vmatpush3.bf16.msra.mxu1 %v983_v8 }
 0x1cd   :  { %948 = vmatpush1.bf16.msra.mxu0 %v947_v10  ;;  %v687_v10 = vld [vmem:[%s1418_s11 + $0x10] sm:$0xff]  ;;  %986 = vmatprep.subr.bf16.mxu1 %v985_v9 }
 0x1ce   :  { %950 = vmatprep.subr.bf16.mxu0 %v949_v13  ;;  %v706_v13 = vld [vmem:[%s1418_s11 + $0xa8] sm:$0xff]  ;;  %v987_v14 = vpack.c.bf16 %v688_v11, %v687_v10 }
 0x1cf   :  { %v989_v15 = vpack.c.bf16 %v706_v13, %v705_v12 }
 0x1d0   :  { %988 = vmatpush3.bf16.msra.mxu1 %v987_v14 }
 0x1d1   :  { %952 = vmatpush1.bf16.msra.mxu0 %v951_v16  ;;  %v689_v16 = vld [vmem:[%s1418_s11 + $0x20] sm:$0xff]  ;;  %990 = vmatprep.subr.bf16.mxu1 %v989_v15 }
 0x1d2   :  { %954 = vmatprep.subr.bf16.mxu0 %v953_v19  ;;  %v991_v18 = vpack.c.bf16 %v690_v17, %v689_v16 }
 0x1d4   :  { %992 = vmatpush3.bf16.msra.mxu1 %v991_v18 }
 0x1d5   :  { %956 = vmatpush1.bf16.msra.mxu0 %v955_v22 }
 0x1d6   :  { %958 = vmatprep.subr.bf16.mxu0 %v957_v25 }
 0x1d9   :  { %960 = vmatpush1.bf16.msra.mxu0 %v959_v29 }
 0x1da   :  { %962 = vmatprep.subr.bf16.mxu0 %v961_v33  ;;  %v420_v33 = vld [vmem:[%s1414_s7] sm:$0x3] }
 0x1dd   :  { %964 = vmatpush1.bf16.msra.mxu0 %v963_v36  ;;  %v421_v36 = vld [vmem:[%s1415_s8] sm:$0x3] }
 0x295   :  { %v409_v41 = vpop.f32.mrb[0].mxu1 }
 0x296   :  { %v1263_v42 = vadd.f32 %v409_v41, %v336_v37  ;;  %v411_v43 = vpop.f32.mrb[1].mxu1  ;;  %v562_v41 = vld [vmem:[#allocation4 + $0x190] sm:$0xff] }
 0x297   :  { %v1265_v45 = vadd.f32 %v411_v43, %v340_v39  ;;  %v565_v43 = vld [vmem:[#allocation4 + $0x1a8] sm:$0xff] }
 0x298   :  { %v430_v47 = vmul.f32 %v1263_v42, %v1263_v42 }
 0x299   :  { %v422_v48 = vadd.f32 %v1265_v45, %v1263_v42  ;;  %v431_v49 = vmul.f32 %v1265_v45, %v1265_v45  ;;  %v415_v50 = vpop.f32.mrb[2].mxu1 }
 0x29a   :  { %v1273_v52 = vadd.f32 %v415_v50, %v336_v37  ;;  %v417_v46 = vpop.f32.mrb[3].mxu1  ;;  %v965_v37 = vpack.c.bf16 %v563_v35, %v561_v34  ;;  %v564_v50 = vld [vmem:[#allocation4 + $0x1a0] sm:$0xff]  ;;  %v454_v34 = vrot.slane %v420_v33, %v1215_v38  ;;  %v458_v35 = vrot.slane %v420_v33, %v1220_v40 }
 0x29b   :  { %423 = vadd.xlane.f32.xlu0 %v422_v48  ;;  %v434_v44 = vadd.f32 %v431_v49, %v430_v47  ;;  %v1275_v54 = vadd.f32 %v417_v46, %v340_v39  ;;  %v560_v39 = vld [vmem:[#allocation4 + $0x180] sm:$0xff]  ;;  %v567_v47 = vld [vmem:[#allocation4 + $0x1b8] sm:$0xff]  ;;  %v566_v46 = vld [vmem:[#allocation4 + $0x1b0] sm:$0xff] }
 0x29c   :  { %v432_v55 = vmul.f32 %v1273_v52, %v1273_v52  ;;  %v967_v48 = vpack.c.bf16 %v562_v41, %v560_v39  ;;  %966 = vmatprep.subr.bf16.mxu0 %v965_v37  ;;  %v969_v49 = vpack.c.bf16 %v567_v47, %v565_v43  ;;  %v473_v43 = vrot.slane %v421_v36, %v1215_v38 }
 0x29d   :  { %435 = vadd.xlane.f32.xlu1 %v434_v44  ;;  %v425_v56 = vadd.f32 %v1275_v54, %v1273_v52  ;;  %v433_v57 = vmul.f32 %v1275_v54, %v1275_v54  ;;  %v569_v44 = vld [vmem:[#allocation4 + $0x1c8] sm:$0xff]  ;;  %v477_v47 = vrot.slane %v421_v36, %v1220_v40 }
 0x29e   :  { %968 = vmatpush1.bf16.msra.mxu0 %v967_v48 }
 0x29f   :  { %426 = vadd.xlane.f32.xlu0 %v425_v56  ;;  %v437_v58 = vadd.f32 %v433_v57, %v432_v55  ;;  %v571_v55 = vld [vmem:[#allocation4 + $0x1d8] sm:$0xff]  ;;  %v971_v56 = vpack.c.bf16 %v566_v46, %v564_v50  ;;  %970 = vmatprep.subr.bf16.mxu0 %v969_v49 }
 0x2a0   :  { %v973_v57 = vpack.c.bf16 %v571_v55, %v569_v44 }
 0x2a1   :  { %438 = vadd.xlane.f32.xlu1 %v437_v58  ;;  %v568_v58 = vld [vmem:[#allocation4 + $0x1c0] sm:$0xff] }
 0x2a2   :  { %972 = vmatpush1.bf16.msra.mxu0 %v971_v56  ;;  %v975_v62 = vpack.c.bf16 %v570_v59, %v568_v58 }
 0x2a3   :  { %974 = vmatprep.subr.bf16.mxu0 %v973_v57 }
 0x2a6   :  { %976 = vmatpush1.bf16.msra.mxu0 %v975_v62 }
 0x2a7   :  { %978 = vmatprep.subr.bf16.mxu0 %v977_v63 }
 0x2aa   :  { %980 = vmatpush1.bf16.msra.mxu0 %v979_v51 }
 0x328   :  { %v424_v19 = vpop.xlane.xlu0 %423 }
 0x329   :  { %v428_v20 = vmul.f32 0.00390625, %v424_v19  ;;  %v707_v19 = vld [vmem:[%s1418_s11 + $0xb0] sm:$0xff] }
 0x32a   :  { %v436_v21 = vpop.xlane.xlu1 %435 }
 0x32b   :  { %v440_v22 = vmul.f32 0.00390625, %v436_v21  ;;  %v442_v23 = vmul.f32 %v428_v20, %v428_v20 }
 0x32c   :  { %v427_v25 = vpop.xlane.xlu0 %426 }
 0x32d   :  { %v444_v24 = vsub.f32 %v440_v22, %v442_v23  ;;  %v429_v26 = vmul.f32 0.00390625, %v427_v25  ;;  %v691_v22 = vld [vmem:[%s1418_s11 + $0x30] sm:$0xff]  ;;  %v692_v23 = vld [vmem:[%s1418_s11 + $0x38] sm:$0xff]  ;;  %v709_v25 = vld [vmem:[%s1418_s11 + $0xc0] sm:$0xff] }
 0x32e   :  { %v439_v28 = vpop.xlane.xlu1 %438 }
 0x32f   :  { %v446_v27 = vadd.f32 1e-05, %v444_v24  ;;  %v441_v29 = vmul.f32 0.00390625, %v439_v28  ;;  %v443_v30 = vmul.f32 %v429_v26, %v429_v26  ;;  %v995_v24 = vpack.c.bf16 %v692_v23, %v691_v22  ;;  %v693_v28 = vld [vmem:[%s1418_s11 + $0x40] sm:$0xff] }
 0x331   :  { %1030 = vrsqrt.f32 %v446_v27  ;;  %v445_v31 = vsub.f32 %v441_v29, %v443_v30  ;;  %v694_v29 = vld [vmem:[%s1418_s11 + $0x48] sm:$0xff] }
 0x332   :  { %v999_v30 = vpack.c.bf16 %v694_v29, %v693_v28 }
 0x333   :  { %v447_v32 = vadd.f32 1e-05, %v445_v31  ;;  %v711_v31 = vld [vmem:[%s1418_s11 + $0xd0] sm:$0xff] }
 0x335   :  { %1032 = vrsqrt.f32 %v447_v32  ;;  %v712_v32 = vld [vmem:[%s1418_s11 + $0xd8] sm:$0xff] }
 0x336   :  { %v1001_v33 = vpack.c.bf16 %v712_v32, %v711_v31 }
 0x33b   :  { %v1031_v37 = vpop.eup %1030 }
 0x33c   :  { %v461_v39 = vmul.f32 %v1031_v37, %v454_v34  ;;  %v462_v41 = vmul.f32 %v1031_v37, %v458_v35  ;;  %v713_v37 = vld [vmem:[%s1418_s11 + $0xe0] sm:$0xff] }
 0x33e   :  { %v465_v48 = vmul.f32 %v461_v39, %v428_v20  ;;  %v466_v49 = vmul.f32 %v462_v41, %v428_v20  ;;  %v484_v46 = vmul.f32 %v461_v39, %v1263_v42  ;;  %v485_v56 = vmul.f32 %v462_v41, %v1265_v45  ;;  %v708_v20 = vld [vmem:[%s1418_s11 + $0xb8] sm:$0xff]  ;;  %v714_v39 = vld [vmem:[%s1418_s11 + $0xe8] sm:$0xff] }
 0x33f   :  { %v1033_v50 = vpop.eup %1032  ;;  %v993_v21 = vpack.c.bf16 %v708_v20, %v707_v19  ;;  %v1005_v41 = vpack.c.bf16 %v714_v39, %v713_v37 }
 0x340   :  { %v480_v44 = vsub.f32 %v473_v43, %v465_v48  ;;  %v481_v55 = vsub.f32 %v477_v47, %v466_v49  ;;  %v464_v57 = vmul.f32 %v1033_v50, %v458_v35  ;;  %v463_v58 = vmul.f32 %v1033_v50, %v454_v34  ;;  %v695_v34 = vld [vmem:[%s1418_s11 + $0x50] sm:$0xff]  ;;  %v696_v35 = vld [vmem:[%s1418_s11 + $0x58] sm:$0xff] }
 0x341   :  { %994 = vmatprep.subr.bf16.mxu1 %v993_v21  ;;  %v1003_v36 = vpack.c.bf16 %v696_v35, %v695_v34  ;;  %v715_v49 = vld [vmem:[%s1418_s11 + $0xf0] sm:$0xff]  ;;  %v716_v50 = vld [vmem:[%s1418_s11 + $0xf8] sm:$0xff] }
 0x342   :  { %v489_v59 = vadd.f32 %v485_v56, %v481_v55  ;;  %v488_v60 = vadd.f32 %v484_v46, %v480_v44  ;;  %v468_v61 = vmul.f32 %v464_v57, %v429_v26  ;;  %v467_v62 = vmul.f32 %v463_v58, %v429_v26  ;;  %996 = vmatpush3.bf16.msra.mxu1 %v995_v24  ;;  %v710_v26 = vld [vmem:[%s1418_s11 + $0xc8] sm:$0xff]  ;;  %v699_v44 = vld [vmem:[%s1418_s11 + $0x70] sm:$0xff]  ;;  %v700_v55 = vld [vmem:[%s1418_s11 + $0x78] sm:$0xff] }
 0x343   :  { %v487_v51 = vmul.f32 %v464_v57, %v1275_v54  ;;  %v486_v2 = vmul.f32 %v463_v58, %v1273_v52  ;;  %v997_v27 = vpack.c.bf16 %v710_v26, %v709_v25  ;;  %v1009_v46 = vpack.c.bf16 %v716_v50, %v715_v49  ;;  %v576_v57 = vld [vmem:[%s1417_s10] sm:$0x3] }
 0x344   :  { %v497_v63 = vmul.f32 0.70710677, %v489_v59  ;;  %v496_v53 = vmul.f32 0.70710677, %v488_v60  ;;  %v483_v0 = vsub.f32 %v477_v47, %v468_v61  ;;  %v482_v1 = vsub.f32 %v473_v43, %v467_v62  ;;  %v697_v43 = vld [vmem:[%s1418_s11 + $0x60] sm:$0xff]  ;;  %v698_v47 = vld [vmem:[%s1418_s11 + $0x68] sm:$0xff] }
 0x345   :  { %v493_v7 = vmul.f32 0.5, %v489_v59  ;;  %v492_v9 = vmul.f32 0.5, %v488_v60  ;;  %998 = vmatprep.subr.bf16.mxu1 %v997_v27  ;;  %v1007_v48 = vpack.c.bf16 %v698_v47, %v697_v43  ;;  %v1011_v56 = vpack.c.bf16 %v700_v55, %v699_v44 }
 0x346   :  { %1034 = verf.f32 %v497_v63  ;;  %v491_v42 = vadd.f32 %v487_v51, %v483_v0  ;;  %v490_v3 = vadd.f32 %v486_v2, %v482_v1  ;;  %1000 = vmatpush3.bf16.msra.mxu1 %v999_v30  ;;  %v581_v58 = vrot.slane %v576_v57, %v1215_v38 }
 0x347   :  { %1036 = verf.f32 %v496_v53  ;;  %1002 = vmatprep.subr.bf16.mxu1 %v1001_v33  ;;  %v585_v59 = vrot.slane %v576_v57, %v1220_v40 }
 0x348   :  { %v499_v4 = vmul.f32 0.70710677, %v491_v42  ;;  %v498_v45 = vmul.f32 0.70710677, %v490_v3  ;;  %v495_v52 = vmul.f32 0.5, %v491_v42  ;;  %v494_v15 = vmul.f32 0.5, %v490_v3 }
 0x34a   :  { %1038 = verf.f32 %v499_v4  ;;  %1004 = vmatpush3.bf16.msra.mxu1 %v1003_v36 }
 0x34b   :  { %1040 = verf.f32 %v498_v45  ;;  %1006 = vmatprep.subr.bf16.mxu1 %v1005_v41 }
 0x34e   :  { %1008 = vmatpush3.bf16.msra.mxu1 %v1007_v48 }
 0x34f   :  { %1010 = vmatprep.subr.bf16.mxu1 %v1009_v46 }
 0x350   :  { %v1035_v5 = vpop.eup %1034 }
 0x351   :  { %v1037_v6 = vpop.eup %1036  ;;  %v505_v8 = vadd.f32 1.0, %v1035_v5 }
 0x352   :  { %v504_v10 = vadd.f32 1.0, %v1037_v6  ;;  %1012 = vmatpush3.bf16.msra.mxu1 %v1011_v56 }
 0x353   :  { %v509_v11 = vmul.f32 %v505_v8, %v493_v7 }
 0x354   :  { %v508_v12 = vmul.f32 %v504_v10, %v492_v9  ;;  %v1039_v54 = vpop.eup %1038 }
 0x355   :  { %652 = vmatprep.mubr.f32.mxu0 %v509_v11  ;;  %v1041_v13 = vpop.eup %1040  ;;  %v507_v14 = vadd.f32 1.0, %v1039_v54 }
 0x356   :  { %653 = vmatmul.mubr.f32.vlgmr.msra.gmra.mrb[4].mxu0 %v508_v12  ;;  %v506_v16 = vadd.f32 1.0, %v1041_v13 }
 0x357   :  { %v511_v17 = vmul.f32 %v507_v14, %v495_v52 }
 0x358   :  { %v510_v18 = vmul.f32 %v506_v16, %v494_v15 }
 0x359   :  { %658 = vmatprep.mubr.f32.mxu0 %v511_v17  ;;  %v810_v17 = vld [vmem:[%s1419_s12] ss:$0 sm:$0xff] }
 0x35a   :  { %659 = vmatmul.mubr.f32.gmra.mrb[6].mxu0 %v510_v18 }
 0x429   :  { %v654_v60 = vpop.f32.mrb[4].mxu0 }
 0x42a   :  { %v655_v61 = vadd.f32 %v654_v60, %v581_v58  ;;  %v656_v62 = vpop.f32.mrb[5].mxu0 }
 0x42b   :  { %v657_v63 = vadd.f32 %v656_v62, %v585_v59 }
 0x42c   :  { %v669_v53 = vmul.f32 0.70710677, %v655_v61  ;;  %v665_v7 = vmul.f32 0.5, %v655_v61 }
 0x42d   :  { %v670_v0 = vmul.f32 0.70710677, %v657_v63  ;;  %v660_v51 = vpop.f32.mrb[6].mxu0  ;;  %v666_v40 = vmul.f32 0.5, %v657_v63 }
 0x42e   :  { %1042 = verf.f32 %v669_v53  ;;  %v661_v1 = vadd.f32 %v660_v51, %v581_v58  ;;  %v662_v2 = vpop.f32.mrb[7].mxu0 }
 0x42f   :  { %1044 = verf.f32 %v670_v0  ;;  %v663_v42 = vadd.f32 %v662_v2, %v585_v59 }
 0x430   :  { %v671_v3 = vmul.f32 0.70710677, %v661_v1  ;;  %v667_v52 = vmul.f32 0.5, %v661_v1 }
 0x431   :  { %v672_v4 = vmul.f32 0.70710677, %v663_v42  ;;  %v668_v54 = vmul.f32 0.5, %v663_v42 }
 0x432   :  { %1046 = verf.f32 %v671_v3 }
 0x433   :  { %1048 = verf.f32 %v672_v4 }
 0x438   :  { %v1043_v45 = vpop.eup %1042 }
 0x439   :  { %v1045_v38 = vpop.eup %1044  ;;  %v677_v5 = vadd.f32 1.0, %v1043_v45 }
 0x43a   :  { %v678_v6 = vadd.f32 1.0, %v1045_v38 }
 0x43b   :  { %v681_v10 = vmul.f32 %v677_v5, %v665_v7 }
 0x43c   :  { %v682_v8 = vmul.f32 %v678_v6, %v666_v40  ;;  %v1047_v9 = vpop.eup %1046 }
 0x43d   :  { %v1049_v11 = vpop.eup %1048  ;;  %v679_v12 = vadd.f32 1.0, %v1047_v9 }
 0x43e   :  { %788 = vmatprep.mubr.f32.mxu1 %v682_v8  ;;  %v680_v13 = vadd.f32 1.0, %v1049_v11 }
 0x43f   :  { %789 = vmatmul.mubr.f32.vlgmr.msra.gmra.mrb[4].mxu1 %v681_v10  ;;  %v683_v15 = vmul.f32 %v679_v12, %v667_v52 }
 0x440   :  { %v684_v14 = vmul.f32 %v680_v13, %v668_v54 }
 0x442   :  { %793 = vmatprep.mubr.f32.mxu1 %v684_v14 }
 0x443   :  { %794 = vmatmul.mubr.f32.gmra.mrb[6].mxu1 %v683_v15 }
 0x512   :  { %v843_v16 = vpop.f32.mrb[4].mxu1 }
 0x513   :  { %v844_v18 = vpop.f32.mrb[5].mxu1 }
 0x514   :  { %v845_v19 = vadd.f32 %v844_v18, %v843_v16 }
 0x516   :  { %v791_v20 = vadd.f32 %v845_v19, %v810_v17  ;;  %v846_v21 = vpop.f32.mrb[6].mxu1 }
 0x517   :  { %v847_v22 = vpop.f32.mrb[7].mxu1 }
 0x518   :  { %800 = vst.msk [vmem:[%s1420_s13] sm:$0xff] %vm799_vm1, %v791_v20  ;;  %v848_v23 = vadd.f32 %v847_v22, %v846_v21 }
 0x51a   :  { %v796_v24 = vadd.f32 %v848_v23, %v810_v17 }
 0x51c   :  { %801 = vst.msk [vmem:[%s1420_s13 + $0x8] sm:$0xff] %vm799_vm1, %v796_v24 }
 0x51d   :  { %806 = vsyncpa [#allocation3], 1 }
 0x51e   :  { %807 = vsyncpa [#allocation5], 1 }

</bundles_post_ra>
